<compile_context>
chip_gen: v7x
topology: tpu7x:2x2x1
jax: 0.10.0
libtpu: 0.0.40
codegen_flags: <defaults>
</compile_context>

<pallas_src>
import functools

import jax
import jax.numpy as jnp
from jax.experimental import pallas as pl
from jax.experimental.pallas import tpu as pltpu


# ---------------------------------------------------------------------------
# Small integer helpers (pure Python so grid / shape math stays static).
# ---------------------------------------------------------------------------
def _cdiv(a, b):
    return -(-a // b)


def _round_up(n, m):
    return _cdiv(n, m) * m


def _num_tensorcores():
    """Best-effort TensorCore count of the local device (2 on v7x, else 1)."""
    try:
        d = jax.devices()[0]
        nc = getattr(d, "num_cores", None)
        if nc:
            return max(1, int(nc))
        kind = str(getattr(d, "device_kind", "")).lower()
        if "v7" in kind:
            return 2
    except Exception:
        pass
    return 1


# ---------------------------------------------------------------------------
# Kernel
# ---------------------------------------------------------------------------
def _finetuner_kernel(x_ref, w1_ref, b1_ref, w2p_ref, b2p_ref, out_ref, *, n_out):
    # fc1 + ReLU. x arrives f32; narrow to the weight dtype in-kernel (VPU cast),
    # accumulate in f32 on the MXU, add the f32 bias.
    x = x_ref[...].astype(w1_ref.dtype)
    h = jnp.dot(x, w1_ref[...], preferred_element_type=jnp.float32)
    h = jnp.maximum(h + b1_ref[...], 0.0)

    # Fused fc_mu + predictor head: h @ (W2 @ Wp) + (b2 @ Wp + bp).
    # W2p/b2p are 128-lane padded (VMEM only); the store below drops the padding.
    h = h.astype(w2p_ref.dtype)
    y = jnp.dot(h, w2p_ref[...], preferred_element_type=jnp.float32) + b2p_ref[...]

    if n_out != y.shape[-1]:
        y = y[:, :n_out]
    out_ref[...] = y.astype(out_ref.dtype)


# ---------------------------------------------------------------------------
# One-time parameter preprocessing (run once per parameter update, NOT per call).
# ---------------------------------------------------------------------------
def prepare_finetuner_params(w1, b1, w2, b2, wp, bp, *, compute_dtype=jnp.bfloat16):
    """Fuse fc_mu with the predictor, pad to 128 lanes, and pre-cast weights."""
    w2f = w2.astype(jnp.float32)
    wpf = wp.astype(jnp.float32)
    w2p = w2f @ wpf                                                   # [H, n_out]
    b2p = b2.astype(jnp.float32).reshape(1, -1) @ wpf \
        + bp.astype(jnp.float32).reshape(1, -1)                       # [1, n_out]

    n_out = wp.shape[-1]
    n_out_pad = max(_round_up(n_out, 128), 128)
    w2p = jnp.pad(w2p, ((0, 0), (0, n_out_pad - n_out)))
    b2p = jnp.pad(b2p, ((0, 0), (0, n_out_pad - n_out)))

    return (w1.astype(compute_dtype),
            b1.astype(jnp.float32).reshape(1, -1),
            w2p.astype(compute_dtype),
            b2p.astype(jnp.float32))


# ---------------------------------------------------------------------------
# Batch tiling plan: one tile per TensorCore, bounded by a VMEM budget.
# ---------------------------------------------------------------------------
def _plan_batch_tiling(B, D_in, n_out, weight_bytes, num_cores):
    # Per-row pipelined VMEM: double-buffered f32 x tile + f32 out tile.
    row_bytes = 2 * (D_in + n_out) * 4
    budget = 40 * 1024 * 1024
    max_tb = max(8, (budget - weight_bytes) // max(row_bytes, 1))
    max_tb = max(8, (max_tb // 8) * 8)

    n_tiles = max(num_cores, _cdiv(B, max_tb))
    tb = _round_up(_cdiv(B, n_tiles), 8)
    B_pad = tb * n_tiles
    return tb, n_tiles, B_pad


# ---------------------------------------------------------------------------
# Jitted forward: pad batch -> pallas_call -> slice batch, all fused under jit.
# ---------------------------------------------------------------------------
@functools.partial(jax.jit, static_argnames=("n_out", "num_cores"))
def finetuner_forward(x, w1_c, b1_f, w2p_c, b2p_f, *, n_out, num_cores=1):
    """FineTuner forward. x: [B, D_in] (f32). Returns logits [B, n_out] (f32)."""
    B, D_in = x.shape
    H = w1_c.shape[1]
    n_out_pad = w2p_c.shape[1]
    itemsize = jnp.dtype(w1_c.dtype).itemsize

    weight_bytes = 2 * ((D_in * H + H * n_out_pad) * itemsize + (H + n_out_pad) * 4)
    tb, n_tiles, B_pad = _plan_batch_tiling(B, D_in, n_out, weight_bytes, num_cores)

    if B_pad != B:
        x = jnp.pad(x, ((0, B_pad - B), (0, 0)))

    # VMEM budget: double-buffered x/out tiles + resident weights/biases
    # (conservative x2) + intermediates/slack. Capped at v7x's 64 MiB.
    vmem_est = (2 * tb * D_in * 4
                + 2 * tb * n_out * 4
                + tb * (H + n_out_pad) * 4
                + weight_bytes
                + (4 << 20))
    vmem_limit = int(min(64 * 1024 * 1024, max(vmem_est, 16 * 1024 * 1024)))

    cost = pl.CostEstimate(
        flops=2 * B_pad * D_in * H + 2 * B_pad * H * n_out_pad,
        transcendentals=0,
        bytes_accessed=(B_pad * D_in * 4            # x (f32)
                        + D_in * H * itemsize       # W1
                        + H * 4                     # b1
                        + H * n_out_pad * itemsize  # fused W2p
                        + n_out_pad * 4             # fused b2p
                        + B_pad * n_out * 4),       # out (unpadded columns)
    )

    kernel = functools.partial(_finetuner_kernel, n_out=n_out)

    out = pl.pallas_call(
        kernel,
        out_shape=jax.ShapeDtypeStruct((B_pad, n_out), jnp.float32),
        grid_spec=pltpu.PrefetchScalarGridSpec(
            num_scalar_prefetch=0,
            grid=(n_tiles,),
            in_specs=[
                pl.BlockSpec((tb, D_in), lambda i: (i, 0)),        # x tile (f32)
                pl.BlockSpec((D_in, H), lambda i: (0, 0)),         # W1 (resident)
                pl.BlockSpec((1, H), lambda i: (0, 0)),            # b1 (f32)
                pl.BlockSpec((H, n_out_pad), lambda i: (0, 0)),    # fused W2p
                pl.BlockSpec((1, n_out_pad), lambda i: (0, 0)),    # fused b2p (f32)
            ],
            # Block last dim equals the full array last dim (n_out) -> legal,
            # and avoids 32x output write amplification vs. a 128-lane pad.
            out_specs=pl.BlockSpec((tb, n_out), lambda i: (i, 0)),
        ),
        compiler_params=pltpu.CompilerParams(
            dimension_semantics=("parallel",),
            vmem_limit_bytes=vmem_limit,
        ),
        cost_estimate=cost,
    )(x, w1_c, b1_f, w2p_c, b2p_f)

    return out[:B]


# ---------------------------------------------------------------------------
# Demo / self-test
# ---------------------------------------------------------------------------
def _init_linear(key, fan_in, fan_out):
    """Deterministic init mimicking torch.nn.Linear (uniform +/- 1/sqrt(fan_in))."""
    kw, kb = jax.random.split(key)
    bound = 1.0 / jnp.sqrt(float(fan_in))
    w = jax.random.uniform(kw, (fan_in, fan_out), jnp.float32, -bound, bound)
    b = jax.random.uniform(kb, (1, fan_out), jnp.float32, -bound, bound)
    return w, b


if __name__ == "__main__":
    # Small shapes consistent with the module (flat feature vectors, small net):
    #   batch=37 (ragged on purpose), input_dim=256, hidden_dim=128,
    #   embed_dim=64, n_output=4.
    B, D_in, H, E, n_output = 37, 256, 128, 64, 4

    key = jax.random.PRNGKey(0)
    kx, k1, k2, kp = jax.random.split(key, 4)

    x = jax.random.normal(kx, (B, D_in), jnp.float32)

    w1, b1 = _init_linear(k1, D_in, H)       # VAE encoder fc1
    w2, b2 = _init_linear(k2, H, E)          # VAE encoder fc_mu (embed_dim = E)
    wp, bp = _init_linear(kp, E, n_output)   # FineTuner.predictor

    # One-time preprocessing (would be redone only when parameters change).
    params = prepare_finetuner_params(w1, b1, w2, b2, wp, bp)
    num_cores = _num_tensorcores()

    out = finetuner_forward(x, *params, n_out=n_output, num_cores=num_cores)
    out = jax.block_until_ready(out)

    # Pure-JAX f32 reference of the original (unfused) forward semantics.
    h_ref = jnp.maximum(x @ w1 + b1, 0.0)
    mu_ref = h_ref @ w2 + b2
    ref = mu_ref @ wp + bp

    assert out.shape == (B, n_output), out.shape
    # bf16 operands with f32 accumulation: loose tolerance vs. the f32 reference.
    assert jnp.allclose(out, ref, atol=5e-2, rtol=5e-2), (
        float(jnp.max(jnp.abs(out - ref))))

    print("KERNEL_OK")
</pallas_src>

<mosaic_0001>
module attributes {stable_mosaic.version = 11 : i64} {
  func.func @_finetuner_kernel(%arg0: i32, %arg1: memref<40x256xf32, #tpu.memory_space<vmem>>, %arg2: memref<256x128xbf16, #tpu.memory_space<vmem>>, %arg3: memref<1x128xf32, #tpu.memory_space<vmem>>, %arg4: memref<128x128xbf16, #tpu.memory_space<vmem>>, %arg5: memref<1x128xf32, #tpu.memory_space<vmem>>, %arg6: memref<40x4xf32, #tpu.memory_space<vmem>>) attributes {dimension_semantics = [#tpu.dimension_semantics<parallel>], iteration_bounds = array<i64: 1>, scalar_prefetch = 0 : i64, scratch_operands = 0 : i64, tpu.core_type = #tpu.core_type<tc>, window_params = [{transform_indices = @transform_0, window_bounds = array<i64: 40, 256>}, {pipeline_mode = #tpu.pipeline_mode<synchronous>, transform_indices = @transform_1, window_bounds = array<i64: 256, 128>}, {pipeline_mode = #tpu.pipeline_mode<synchronous>, transform_indices = @transform_2, window_bounds = array<i64: 1, 128>}, {pipeline_mode = #tpu.pipeline_mode<synchronous>, transform_indices = @transform_3, window_bounds = array<i64: 128, 128>}, {pipeline_mode = #tpu.pipeline_mode<synchronous>, transform_indices = @transform_4, window_bounds = array<i64: 1, 128>}, {transform_indices = @transform_5, window_bounds = array<i64: 40, 4>}]} {
    %c0 = arith.constant 0 : index
    %c0_0 = arith.constant 0 : index
    %0 = vector.load %arg1[%c0, %c0_0] : memref<40x256xf32, #tpu.memory_space<vmem>>, vector<40x256xf32>
    %1 = arith.truncf %0 : vector<40x256xf32> to vector<40x256xbf16>
    %c0_1 = arith.constant 0 : index
    %c0_2 = arith.constant 0 : index
    %2 = vector.load %arg2[%c0_1, %c0_2] : memref<256x128xbf16, #tpu.memory_space<vmem>>, vector<256x128xbf16>
    %cst = arith.constant dense<0.000000e+00> : vector<40x128xf32>
    %3 = tpu.matmul %1, %2, %cst {dimension_numbers = #tpu.dot_dimension_numbers<[1], [0], [0], [1], [0, 0, 1, 1], [], []>} : vector<40x256xbf16>, vector<256x128xbf16>, vector<40x128xf32> -> vector<40x128xf32>
    %c0_3 = arith.constant 0 : index
    %c0_4 = arith.constant 0 : index
    %4 = vector.load %arg3[%c0_3, %c0_4] : memref<1x128xf32, #tpu.memory_space<vmem>>, vector<1x128xf32>
    %5 = vector.broadcast %4 : vector<1x128xf32> to vector<40x128xf32>
    %6 = arith.addf %3, %5 : vector<40x128xf32>
    %cst_5 = arith.constant 0.000000e+00 : f32
    %7 = vector.broadcast %cst_5 : f32 to vector<40x128xf32>
    %8 = arith.maximumf %6, %7 : vector<40x128xf32>
    %9 = arith.truncf %8 : vector<40x128xf32> to vector<40x128xbf16>
    %c0_6 = arith.constant 0 : index
    %c0_7 = arith.constant 0 : index
    %10 = vector.load %arg4[%c0_6, %c0_7] : memref<128x128xbf16, #tpu.memory_space<vmem>>, vector<128x128xbf16>
    %cst_8 = arith.constant dense<0.000000e+00> : vector<40x128xf32>
    %11 = tpu.matmul %9, %10, %cst_8 {dimension_numbers = #tpu.dot_dimension_numbers<[1], [0], [0], [1], [0, 0, 1, 1], [], []>} : vector<40x128xbf16>, vector<128x128xbf16>, vector<40x128xf32> -> vector<40x128xf32>
    %c0_9 = arith.constant 0 : index
    %c0_10 = arith.constant 0 : index
    %12 = vector.load %arg5[%c0_9, %c0_10] : memref<1x128xf32, #tpu.memory_space<vmem>>, vector<1x128xf32>
    %13 = vector.broadcast %12 : vector<1x128xf32> to vector<40x128xf32>
    %14 = arith.addf %11, %13 : vector<40x128xf32>
    %15 = vector.extract_strided_slice %14 {offsets = [0, 0], sizes = [40, 4], strides = [1, 1]} : vector<40x128xf32> to vector<40x4xf32>
    %c0_11 = arith.constant 0 : index
    %c0_12 = arith.constant 0 : index
    %16 = vector.load %arg6[%c0_11, %c0_12] : memref<40x4xf32, #tpu.memory_space<vmem>>, vector<40x4xf32>
    tpu.vector_store %arg6[%c0_11, %c0_12], %15 {strides = array<i32>} : memref<40x4xf32, #tpu.memory_space<vmem>>, vector<40x4xf32>,
    return
  }
  func.func @transform_0(%arg0: i32) -> (i32, i32) {
    %c0_i32 = arith.constant 0 : i32
    %c0_i32_0 = arith.constant 0 : i32
    return %arg0, %c0_i32 : i32, i32
  }
  func.func @transform_1(%arg0: i32) -> (i32, i32) {
    %c0_i32 = arith.constant 0 : i32
    %c0_i32_0 = arith.constant 0 : i32
    %c0_i32_1 = arith.constant 0 : i32
    return %c0_i32, %c0_i32_0 : i32, i32
  }
  func.func @transform_2(%arg0: i32) -> (i32, i32) {
    %c0_i32 = arith.constant 0 : i32
    %c0_i32_0 = arith.constant 0 : i32
    %c0_i32_1 = arith.constant 0 : i32
    return %c0_i32, %c0_i32_0 : i32, i32
  }
  func.func @transform_3(%arg0: i32) -> (i32, i32) {
    %c0_i32 = arith.constant 0 : i32
    %c0_i32_0 = arith.constant 0 : i32
    %c0_i32_1 = arith.constant 0 : i32
    return %c0_i32, %c0_i32_0 : i32, i32
  }
  func.func @transform_4(%arg0: i32) -> (i32, i32) {
    %c0_i32 = arith.constant 0 : i32
    %c0_i32_0 = arith.constant 0 : i32
    %c0_i32_1 = arith.constant 0 : i32
    return %c0_i32, %c0_i32_0 : i32, i32
  }
  func.func @transform_5(%arg0: i32) -> (i32, i32) {
    %c0_i32 = arith.constant 0 : i32
    %c0_i32_0 = arith.constant 0 : i32
    return %arg0, %c0_i32 : i32, i32
  }
}

</mosaic_0001>

<bundles_post_ra>
// kernel: finetuner_forward.1
= control target key start
LH: loop header
LB: loop body
LE: loop exit
PB: predicated region body
PF: predicated region fallthrough
CT: control target
= control target key end

     0   :  { %10 = vsyncpa [#allocation3], 0  ;;  %s540_s18 = smov [#allocation2]   ;;  %s705_s0 = inlined_call_operand.vmem [shape: f32[40,256], index: 0, kind: input, shape index: {}]   ;;  %s706_s1 = inlined_call_operand.vmem [shape: bf16[256,128], index: 1, kind: input, shape index: {}]   ;;  %s707_s2 = inlined_call_operand.vmem [shape: f32[1,128], index: 2, kind: input, shape index: {}]   ;;  %s708_s3 = inlined_call_operand.hbm [shape: bf16[128,128], index: 3, kind: input, shape index: {}]   ;;  %s709_s4 = inlined_call_operand.vmem [shape: f32[1,128], index: 4, kind: input, shape index: {}]   ;;  %s710_s5 = inlined_call_operand.vmem [shape: f32[40,4], index: 5, kind: output, shape index: {}]  }
   0x1   :  { %s22_s19 = sshll.u32 %s540_s18, 4  ;;  %s516_s22 = scalar_lea.hbm %s708_s3, 1024  ;;  %s23_s19 = int_to_ptr.vmem [resolvable:$true] %s22_s19 }
   0x2   :  { %p517_p0 = scmp.ne.s32.totalorder %s708_s3, %s516_s22  ;;  %p520_p1 = scmp.lt.u32.totalorder %s516_s22, %s708_s3 }
   0x4   :  { %p522_p2 = pnand %p520_p1, %p517_p0 }
   0x6   :  { %525 = shalt.err (!%p522_p2)
}
   0x7   :  { %s526_s27 = scalar_lea.vmem %s23_s19, 1024  ;;  %p531_p4 = scmp.lt.s32.totalorder %s23_s19, %s23_s19 }
   0x8   :  { %p527_p3 = scmp.ne.s32.totalorder %s23_s19, %s526_s27  ;;  %p532_p5 = scmp.lt.s32.totalorder %s526_s27, %s526_s27 }
   0xa   :  { %p533_p6 = por %p532_p5, %p531_p4 }
   0xc   :  { %p534_p7 = pnand %p533_p6, %p527_p3 }
   0xe   :  { %537 = shalt.err (!%p534_p7)
}
   0xf   :  { %s541_s28 = smov 64   ;;  %s542_s29 = smov 4  }
  0x10   :  { %28 = dma.hbm_to_vmem [thread:$0]  %s708_s3, 1024, %s23_s19, [#allocation3], %s541_s28, %s541_s28, %s542_s29  }
  0x11   :  { %538 = dma.done.wait [#allocation3], 1024  }
  0x12   :  { %539 = vsyncadd [#allocation3], 4294966272  ;;  %v543_v0 = vmov 0.0   ;;  %v492_v1 = vld [vmem:[%s706_s1 + $0x40] sm:$0xff]   ;;  %v494_v3 = vld [vmem:[%s706_s1 + $0x48] sm:$0xff]   ;;  %vm544_vm0 = vmmov 0  }
  0x13   :  { %459 = vmatprep.subr.bf16.mxu1 %v543_v0  ;;  %v493_v2 = vld [vmem:[%s706_s1] sm:$0xff]   ;;  %414 = vmatprep.subr.bf16.mxu0 %v492_v1  ;;  %v495_v4 = vld [vmem:[%s706_s1 + $0x8] sm:$0xff]   ;;  %v496_v5 = vld [vmem:[%s706_s1 + $0x50] sm:$0xff]   ;;  %vm377_vm1 = vcmask 31744  }
  0x14   :  { %415 = vmatpush3.bf16.msra.mxu0 %v493_v2  ;;  %v497_v6 = vld [vmem:[%s706_s1 + $0x10] sm:$0xff]   ;;  %v498_v7 = vld [vmem:[%s706_s1 + $0x58] sm:$0xff]   ;;  %v500_v9 = vld [vmem:[%s706_s1 + $0x60] sm:$0xff]   ;;  %475 = vmatprep.mubr.msk.bf16.mxu1 %vm544_vm0, %v543_v0 }
  0x15   :  { %416 = vmatprep.subr.bf16.mxu0 %v494_v3  ;;  %v499_v8 = vld [vmem:[%s706_s1 + $0x18] sm:$0xff]   ;;  %v501_v10 = vld [vmem:[%s706_s1 + $0x20] sm:$0xff]   ;;  %v502_v11 = vld [vmem:[%s706_s1 + $0x68] sm:$0xff]  }
  0x16   :  { %v36_v12 = vld [vmem:[%s705_s0 + $0x8] sm:$0xff]  ;;  %v38_v13 = vld [vmem:[%s705_s0 + $0x18] sm:$0xff]  ;;  %v504_v16 = vld [vmem:[%s706_s1 + $0x70] sm:$0xff]  }
  0x17   :  { %v46_v14 = vpack.c.bf16 %v38_v13, %v36_v12  ;;  %v503_v15 = vld [vmem:[%s706_s1 + $0x28] sm:$0xff]   ;;  %v508_v17 = vld [vmem:[#allocation2] sm:$0xff]   ;;  %v505_v19 = vld [vmem:[%s706_s1 + $0x30] sm:$0xff]  }
  0x18   :  { %417 = vmatpush3.bf16.msra.mxu0 %v495_v4  ;;  %460 = vmatpush3.bf16.msra.mxu1 %v508_v17  ;;  %v509_v18 = vld [vmem:[#allocation2 + $0x8] sm:$0xff]   ;;  %v506_v20 = vld [vmem:[%s706_s1 + $0x78] sm:$0xff]   ;;  %v510_v21 = vld [vmem:[#allocation2 + $0x10] sm:$0xff]  }
  0x19   :  { %418 = vmatprep.subr.bf16.mxu0 %v496_v5  ;;  %218 = vmatprep.mubr.bf16.mxu0 %v46_v14  ;;  %v507_v22 = vld [vmem:[%s706_s1 + $0x38] sm:$0xff]   ;;  %v35_v23 = vld [vmem:[%s705_s0] sm:$0xff]  ;;  %v37_v24 = vld [vmem:[%s705_s0 + $0x10] sm:$0xff] }
  0x1a   :  { %461 = vmatprep.subr.bf16.mxu1 %v543_v0  ;;  %v40_v25 = vld [vmem:[%s705_s0 + $0x28] sm:$0xff]  ;;  %v42_v26 = vld [vmem:[%s705_s0 + $0x38] sm:$0xff]  ;;  %v45_v27 = vpack.c.bf16 %v37_v24, %v35_v23  ;;  %v512_v30 = vld [vmem:[#allocation2 + $0x20] sm:$0xff]  }
  0x1b   :  { %v511_v28 = vld [vmem:[#allocation2 + $0x18] sm:$0xff]   ;;  %v48_v29 = vpack.c.bf16 %v42_v26, %v40_v25  ;;  %v39_v31 = vld [vmem:[%s705_s0 + $0x20] sm:$0xff]  ;;  %v41_v32 = vld [vmem:[%s705_s0 + $0x30] sm:$0xff] }
  0x1c   :  { %419 = vmatpush3.bf16.msra.mxu0 %v497_v6  ;;  %462 = vmatpush3.bf16.msra.mxu1 %v509_v18  ;;  %v44_v33 = vld [vmem:[%s705_s0 + $0x48] sm:$0xff]  ;;  %v47_v34 = vpack.c.bf16 %v41_v32, %v39_v31  ;;  %v43_v36 = vld [vmem:[%s705_s0 + $0x40] sm:$0xff]  ;;  %v514_v39 = vld [vmem:[#allocation2 + $0x30] sm:$0xff]  }
  0x1d   :  { %420 = vmatprep.subr.bf16.mxu0 %v498_v7  ;;  %463 = vmatprep.subr.bf16.mxu1 %v543_v0  ;;  %v50_v35 = vpack.c.bf16 %v44_v33, %v44_v33  ;;  %v49_v37 = vpack.c.bf16 %v43_v36, %v43_v36  ;;  %v513_v38 = vld [vmem:[#allocation2 + $0x28] sm:$0xff]   ;;  %v515_v40 = vld [vmem:[#allocation2 + $0x38] sm:$0xff]   ;;  %v388_v42 = vld [vmem:[%s707_s2] ss:$0 sm:$0xff] }
  0x20   :  { %421 = vmatpush3.bf16.msra.mxu0 %v499_v8  ;;  %464 = vmatpush3.bf16.msra.mxu1 %v510_v21 }
  0x21   :  { %422 = vmatprep.subr.bf16.mxu0 %v500_v9  ;;  %465 = vmatprep.subr.bf16.mxu1 %v543_v0  ;;  %v405_v9 = vld [vmem:[%s709_s4] ss:$0 sm:$0xff] }
  0x24   :  { %423 = vmatpush3.bf16.msra.mxu0 %v501_v10  ;;  %466 = vmatpush3.bf16.msra.mxu1 %v511_v28 }
  0x25   :  { %424 = vmatprep.subr.bf16.mxu0 %v502_v11  ;;  %467 = vmatprep.subr.bf16.mxu1 %v543_v0 }
  0x28   :  { %425 = vmatpush3.bf16.msra.mxu0 %v503_v15  ;;  %468 = vmatpush3.bf16.msra.mxu1 %v512_v30 }
  0x29   :  { %426 = vmatprep.subr.bf16.mxu0 %v504_v16  ;;  %469 = vmatprep.subr.bf16.mxu1 %v543_v0 }
  0x2c   :  { %427 = vmatpush3.bf16.msra.mxu0 %v505_v19  ;;  %470 = vmatpush3.bf16.msra.mxu1 %v513_v38 }
  0x2d   :  { %428 = vmatprep.subr.bf16.mxu0 %v506_v20  ;;  %471 = vmatprep.subr.bf16.mxu1 %v543_v0 }
  0x30   :  { %429 = vmatpush3.bf16.msra.mxu0 %v507_v22  ;;  %472 = vmatpush3.bf16.msra.mxu1 %v514_v39 }
  0x31   :  { %473 = vmatprep.subr.bf16.mxu1 %v543_v0 }
  0x33   :  { %219 = vmatmul.mubr.bf16.vlgmr.msra.gmra.mrb[0].mxu0 %v45_v27 }
  0x34   :  { %226 = vmatprep.mubr.bf16.mxu0 %v48_v29  ;;  %474 = vmatpush3.bf16.msra.mxu1 %v515_v40 }
  0x3b   :  { %227 = vmatmul.mubr.bf16.gmra.mrb[4].mxu0 %v47_v34 }
  0x3c   :  { %234 = vmatprep.mubr.bf16.mxu0 %v50_v35 }
  0x43   :  { %235 = vmatmul.mubr.bf16.gmra.mrb[8].mxu0 %v49_v37 }
 0x106   :  { %v430_v41 = vpop.f32.mrb[0].mxu0 }
 0x107   :  { %v431_v43 = vpop.f32.mrb[1].mxu0 }
 0x108   :  { %v432_v44 = vadd.f32 %v431_v43, %v430_v41  ;;  %v433_v45 = vpop.f32.mrb[2].mxu0 }
 0x109   :  { %v434_v46 = vpop.f32.mrb[3].mxu0 }
 0x10a   :  { %v221_v47 = vadd.f32 %v432_v44, %v388_v42  ;;  %v435_v48 = vadd.f32 %v434_v46, %v433_v45 }
 0x10c   :  { %v224_v49 = vadd.f32 %v435_v48, %v388_v42  ;;  %v242_v50 = vmax.f32 %v221_v47, 0.0 }
 0x10e   :  { %v243_v51 = vmax.f32 %v224_v49, 0.0  ;;  %v436_v52 = vpop.f32.mrb[4].mxu0 }
 0x10f   :  { %v437_v53 = vpop.f32.mrb[5].mxu0 }
 0x110   :  { %v438_v54 = vadd.f32 %v437_v53, %v436_v52  ;;  %v439_v55 = vpop.f32.mrb[6].mxu0  ;;  %v247_v56 = vpack.c.bf16 %v243_v51, %v242_v50 }
 0x111   :  { %v440_v57 = vpop.f32.mrb[7].mxu0 }
 0x112   :  { %v229_v58 = vadd.f32 %v438_v54, %v388_v42  ;;  %v441_v59 = vadd.f32 %v440_v57, %v439_v55  ;;  %476 = vmatmul.mubr.bf16.vlgmr.msra.gmra.mrb[0].mxu1 %v247_v56 }
 0x113   :  { %479 = vmatprep.mubr.msk.bf16.mxu1 %vm544_vm0, %v543_v0 }
 0x114   :  { %v232_v60 = vadd.f32 %v441_v59, %v388_v42  ;;  %v244_v61 = vmax.f32 %v229_v58, 0.0 }
 0x116   :  { %v245_v62 = vmax.f32 %v232_v60, 0.0  ;;  %v442_v63 = vpop.f32.mrb[8].mxu0 }
 0x117   :  { %v443_v1 = vpop.f32.mrb[9].mxu0 }
 0x118   :  { %v444_v2 = vadd.f32 %v443_v1, %v442_v63  ;;  %v445_v3 = vpop.f32.mrb[10].mxu0  ;;  %v248_v4 = vpack.c.bf16 %v245_v62, %v244_v61 }
 0x119   :  { %v446_v5 = vpop.f32.mrb[11].mxu0 }
 0x11a   :  { %v237_v6 = vadd.f32 %v444_v2, %v388_v42  ;;  %480 = vmatmul.mubr.bf16.gmra.mrb[4].mxu1 %v248_v4 }
 0x11b   :  { %483 = vmatprep.mubr.msk.bf16.mxu1 %vm544_vm0, %v543_v0 }
 0x11c   :  { %v246_v7 = vmax.f32 %v237_v6, 0.0 }
 0x11e   :  { %v249_v8 = vpack.c.bf16 %v246_v7, %v246_v7 }
 0x122   :  { %484 = vmatmul.mubr.bf16.gmra.mrb[8].mxu1 %v249_v8 }
 0x1e5   :  { %v355_v10 = vpop.f32.mrb[0].mxu1 }
 0x1e6   :  { %v356_v11 = vadd.f32 %v405_v9, %v355_v10  ;;  %v477_v12 = vpop.f32.mrb[1].mxu1 }
 0x1e7   :  { %v358_v13 = vpop.f32.mrb[2].mxu1 }
 0x1e8   :  { %378 = vst.msk [vmem:[%s710_s5] sm:$0xff] %vm377_vm1, %v356_v11  ;;  %v359_v14 = vadd.f32 %v405_v9, %v358_v13  ;;  %v478_v15 = vpop.f32.mrb[3].mxu1 }
 0x1ea   :  { %379 = vst.msk [vmem:[%s710_s5 + $0x8] sm:$0xff] %vm377_vm1, %v359_v14 }
 0x1ed   :  { %v363_v0 = vpop.f32.mrb[4].mxu1 }
 0x1ee   :  { %v364_v16 = vadd.f32 %v405_v9, %v363_v0  ;;  %v481_v17 = vpop.f32.mrb[5].mxu1 }
 0x1ef   :  { %v366_v18 = vpop.f32.mrb[6].mxu1 }
 0x1f0   :  { %380 = vst.msk [vmem:[%s710_s5 + $0x10] sm:$0xff] %vm377_vm1, %v364_v16  ;;  %v367_v19 = vadd.f32 %v405_v9, %v366_v18  ;;  %v482_v20 = vpop.f32.mrb[7].mxu1 }
 0x1f2   :  { %381 = vst.msk [vmem:[%s710_s5 + $0x18] sm:$0xff] %vm377_vm1, %v367_v19 }
 0x1f5   :  { %v371_v21 = vpop.f32.mrb[8].mxu1 }
 0x1f6   :  { %v372_v22 = vadd.f32 %v405_v9, %v371_v21  ;;  %v485_v23 = vpop.f32.mrb[9].mxu1 }
 0x1f7   :  { %v374_v24 = vpop.f32.mrb[10].mxu1 }
 0x1f8   :  { %382 = vst.msk [vmem:[%s710_s5 + $0x20] sm:$0xff] %vm377_vm1, %v372_v22  ;;  %v486_v25 = vpop.f32.mrb[11].mxu1 }
 0x1f9   :  { %387 = vsyncpa [#allocation3], 1 }

</bundles_post_ra>
